<compile_context>
chip_gen: v7x
topology: tpu7x:2x2x1
jax: 0.10.0
libtpu: 0.0.40
codegen_flags: <defaults>
</compile_context>

<pallas_src>
import jax
import jax.numpy as jnp
from jax.experimental import pallas as pl
from jax.experimental.pallas import tpu as pltpu

NEG_SLOPE = 0.01     # nn.LeakyReLU default negative_slope
LANE = 128           # TPU lane width
SUBLANE = 8          # TPU sublane width
DEFAULT_TILE_B = 8192


def _round_up(n, m):
    return ((n + m - 1) // m) * m


def _leaky_relu(x):
    return jnp.where(x > 0, x, NEG_SLOPE * x)


def heightmap_encoder_kernel(x_ref, w1_ref, b1_ref, w2_ref, b2_ref, o_ref):
    # One batch tile per grid step; weights/biases are resident VMEM blocks
    # (constant index_map). Compute runs on 128-lane padded features; only the
    # final store is narrowed to the real output width.
    x = x_ref[...]

    h = jnp.dot(x, w1_ref[...], preferred_element_type=jnp.float32) + b1_ref[...]
    h = _leaky_relu(h)

    y = jnp.dot(h.astype(w2_ref.dtype), w2_ref[...],
                preferred_element_type=jnp.float32) + b2_ref[...]
    y = _leaky_relu(y)

    out_features = o_ref.shape[-1]          # static (60)
    o_ref[...] = y[:, :out_features].astype(o_ref.dtype)


def _pad_params(params):
    """Zero-pad feature dims to multiples of 128 lanes (weights stored (in, out))."""
    w1, b1, w2, b2 = params["w1"], params["b1"], params["w2"], params["b2"]
    _, f1 = w1.shape
    _, f2 = w2.shape
    f1p = _round_up(f1, LANE)
    f2p = _round_up(f2, LANE)

    w1p = jnp.pad(w1, ((0, 0), (0, f1p - f1)))
    b1p = jnp.pad(b1, ((0, 0), (0, f1p - f1)))
    w2p = jnp.pad(w2, ((0, f1p - f1), (0, f2p - f2)))
    b2p = jnp.pad(b2, ((0, 0), (0, f2p - f2)))
    return (w1p, b1p, w2p, b2p), f1, f2


def heightmap_encoder(x, params, *, tile_b=DEFAULT_TILE_B):
    """x: (batch, in_channels) float32.
    params: dict with w1 (in,f1), b1 (1,f1), w2 (f1,f2), b2 (1,f2)."""
    (w1p, b1p, w2p, b2p), f1, out_features = _pad_params(params)
    batch, in_ch = x.shape
    f1p = w1p.shape[1]
    f2p = w2p.shape[1]

    # Batch tile: large to amortize per-step overhead, multiple of 8 sublanes,
    # never bigger than (rounded-up) batch. No batch padding of x: the grid's
    # boundary block is masked by Pallas (rows are independent).
    tb = min(int(tile_b), _round_up(batch, SUBLANE))
    tb = _round_up(tb, SUBLANE)
    grid = (pl.cdiv(batch, tb),)

    itemsize = x.dtype.itemsize
    flops = 2 * batch * (in_ch * f1 + f1 * out_features)
    bytes_accessed = (
        batch * in_ch * itemsize                 # x read
        + batch * out_features * itemsize        # y write (narrow store)
        + sum(int(p.size) * 4 for p in (w1p, b1p, w2p, b2p))
    )

    out = pl.pallas_call(
        heightmap_encoder_kernel,
        out_shape=jax.ShapeDtypeStruct((batch, out_features), x.dtype),
        grid_spec=pltpu.PrefetchScalarGridSpec(
            num_scalar_prefetch=0,
            grid=grid,
            in_specs=[
                pl.BlockSpec((tb, in_ch), lambda i: (i, 0)),      # x tile (streamed)
                pl.BlockSpec((in_ch, f1p), lambda i: (0, 0)),     # w1 (resident)
                pl.BlockSpec((1, f1p), lambda i: (0, 0)),         # b1 (resident)
                pl.BlockSpec((f1p, f2p), lambda i: (0, 0)),       # w2 (resident)
                pl.BlockSpec((1, f2p), lambda i: (0, 0)),         # b2 (resident)
            ],
            out_specs=pl.BlockSpec((tb, out_features), lambda i: (i, 0)),
        ),
        compiler_params=pltpu.CompilerParams(
            dimension_semantics=("parallel",),       # megacore sharding on v7x
            vmem_limit_bytes=48 * 1024 * 1024,       # tb=8192 tiles fit on v5e/v6e/v7x
        ),
        cost_estimate=pl.CostEstimate(
            flops=int(flops), transcendentals=0, bytes_accessed=int(bytes_accessed)
        ),
    )(x, w1p, b1p, w2p, b2p)
    return out


def init_params(key, in_channels, encoder_features=(80, 60)):
    """Deterministic init mirroring nn.Linear default (uniform +/- 1/sqrt(fan_in)).
    Weights stored transposed: (in_features, out_features)."""
    params = {}
    fan_in = in_channels
    for i, feat in enumerate(encoder_features, start=1):
        key, kw, kb = jax.random.split(key, 3)
        bound = 1.0 / jnp.sqrt(fan_in)
        params[f"w{i}"] = jax.random.uniform(
            kw, (fan_in, feat), jnp.float32, minval=-bound, maxval=bound
        )
        params[f"b{i}"] = jax.random.uniform(
            kb, (1, feat), jnp.float32, minval=-bound, maxval=bound
        )
        fan_in = feat
    return params


def reference_forward(x, params):
    h = x @ params["w1"] + params["b1"]
    h = jnp.where(h > 0, h, NEG_SLOPE * h)
    y = h @ params["w2"] + params["b2"]
    y = jnp.where(y > 0, y, NEG_SLOPE * y)
    return y


if __name__ == "__main__":
    key = jax.random.PRNGKey(0)
    batch, in_channels = 2, 16
    encoder_features = (80, 60)

    key, kx = jax.random.split(key)
    x = jax.random.normal(kx, (batch, in_channels), jnp.float32)
    params = init_params(key, in_channels, encoder_features)

    out = heightmap_encoder(x, params)
    out = jax.block_until_ready(out)

    ref = reference_forward(x, params)
    assert out.shape == (batch, encoder_features[-1])
    assert jnp.allclose(out, ref, atol=1e-5, rtol=1e-5), "mismatch vs reference"

    # Larger, non-tile-multiple batch: exercises multi-step grid + masked boundary block.
    key, kx2 = jax.random.split(key)
    x_big = jax.random.normal(kx2, (3000, in_channels), jnp.float32)
    out_big = jax.block_until_ready(heightmap_encoder(x_big, params, tile_b=1024))
    ref_big = reference_forward(x_big, params)
    assert out_big.shape == (3000, encoder_features[-1])
    assert jnp.allclose(out_big, ref_big, atol=1e-4, rtol=1e-4), "mismatch vs reference (big)"

    print("KERNEL_OK")
</pallas_src>

<mosaic_0001>
module attributes {stable_mosaic.version = 11 : i64} {
  func.func @heightmap_encoder_kernel(%arg0: i32, %arg1: memref<8x16xf32, #tpu.memory_space<vmem>>, %arg2: memref<16x128xf32, #tpu.memory_space<vmem>>, %arg3: memref<1x128xf32, #tpu.memory_space<vmem>>, %arg4: memref<128x128xf32, #tpu.memory_space<vmem>>, %arg5: memref<1x128xf32, #tpu.memory_space<vmem>>, %arg6: memref<8x60xf32, #tpu.memory_space<vmem>>) attributes {dimension_semantics = [#tpu.dimension_semantics<parallel>], iteration_bounds = array<i64: 1>, scalar_prefetch = 0 : i64, scratch_operands = 0 : i64, tpu.core_type = #tpu.core_type<tc>, window_params = [{transform_indices = @transform_0, window_bounds = array<i64: 8, 16>}, {pipeline_mode = #tpu.pipeline_mode<synchronous>, transform_indices = @transform_1, window_bounds = array<i64: 16, 128>}, {pipeline_mode = #tpu.pipeline_mode<synchronous>, transform_indices = @transform_2, window_bounds = array<i64: 1, 128>}, {pipeline_mode = #tpu.pipeline_mode<synchronous>, transform_indices = @transform_3, window_bounds = array<i64: 128, 128>}, {pipeline_mode = #tpu.pipeline_mode<synchronous>, transform_indices = @transform_4, window_bounds = array<i64: 1, 128>}, {transform_indices = @transform_5, window_bounds = array<i64: 8, 60>}]} {
    %c0 = arith.constant 0 : index
    %c0_0 = arith.constant 0 : index
    %0 = vector.load %arg1[%c0, %c0_0] : memref<8x16xf32, #tpu.memory_space<vmem>>, vector<8x16xf32>
    %c0_1 = arith.constant 0 : index
    %c0_2 = arith.constant 0 : index
    %1 = vector.load %arg2[%c0_1, %c0_2] : memref<16x128xf32, #tpu.memory_space<vmem>>, vector<16x128xf32>
    %cst = arith.constant dense<0.000000e+00> : vector<8x128xf32>
    %2 = tpu.matmul %0, %1, %cst {dimension_numbers = #tpu.dot_dimension_numbers<[1], [0], [0], [1], [0, 0, 1, 1], [], []>} : vector<8x16xf32>, vector<16x128xf32>, vector<8x128xf32> -> vector<8x128xf32>
    %c0_3 = arith.constant 0 : index
    %c0_4 = arith.constant 0 : index
    %3 = vector.load %arg3[%c0_3, %c0_4] : memref<1x128xf32, #tpu.memory_space<vmem>>, vector<1x128xf32>
    %4 = vector.broadcast %3 : vector<1x128xf32> to vector<8x128xf32>
    %5 = arith.addf %2, %4 : vector<8x128xf32>
    %cst_5 = arith.constant 0.000000e+00 : f32
    %6 = vector.broadcast %cst_5 : f32 to vector<8x128xf32>
    %7 = arith.cmpf ogt, %5, %6 : vector<8x128xf32>
    %cst_6 = arith.constant 0.00999999977 : f32
    %8 = vector.broadcast %cst_6 : f32 to vector<8x128xf32>
    %9 = arith.mulf %8, %5 : vector<8x128xf32>
    %10 = arith.select %7, %5, %9 : vector<8x128xi1>, vector<8x128xf32>
    %c0_7 = arith.constant 0 : index
    %c0_8 = arith.constant 0 : index
    %11 = vector.load %arg4[%c0_7, %c0_8] : memref<128x128xf32, #tpu.memory_space<vmem>>, vector<128x128xf32>
    %cst_9 = arith.constant dense<0.000000e+00> : vector<8x128xf32>
    %12 = tpu.matmul %10, %11, %cst_9 {dimension_numbers = #tpu.dot_dimension_numbers<[1], [0], [0], [1], [0, 0, 1, 1], [], []>} : vector<8x128xf32>, vector<128x128xf32>, vector<8x128xf32> -> vector<8x128xf32>
    %c0_10 = arith.constant 0 : index
    %c0_11 = arith.constant 0 : index
    %13 = vector.load %arg5[%c0_10, %c0_11] : memref<1x128xf32, #tpu.memory_space<vmem>>, vector<1x128xf32>
    %14 = vector.broadcast %13 : vector<1x128xf32> to vector<8x128xf32>
    %15 = arith.addf %12, %14 : vector<8x128xf32>
    %cst_12 = arith.constant 0.000000e+00 : f32
    %16 = vector.broadcast %cst_12 : f32 to vector<8x128xf32>
    %17 = arith.cmpf ogt, %15, %16 : vector<8x128xf32>
    %cst_13 = arith.constant 0.00999999977 : f32
    %18 = vector.broadcast %cst_13 : f32 to vector<8x128xf32>
    %19 = arith.mulf %18, %15 : vector<8x128xf32>
    %20 = arith.select %17, %15, %19 : vector<8x128xi1>, vector<8x128xf32>
    %21 = vector.extract_strided_slice %20 {offsets = [0, 0], sizes = [8, 60], strides = [1, 1]} : vector<8x128xf32> to vector<8x60xf32>
    %c0_14 = arith.constant 0 : index
    %c0_15 = arith.constant 0 : index
    %22 = vector.load %arg6[%c0_14, %c0_15] : memref<8x60xf32, #tpu.memory_space<vmem>>, vector<8x60xf32>
    tpu.vector_store %arg6[%c0_14, %c0_15], %21 {strides = array<i32>} : memref<8x60xf32, #tpu.memory_space<vmem>>, vector<8x60xf32>,
    return
  }
  func.func @transform_0(%arg0: i32) -> (i32, i32) {
    %c0_i32 = arith.constant 0 : i32
    %c0_i32_0 = arith.constant 0 : i32
    return %arg0, %c0_i32 : i32, i32
  }
  func.func @transform_1(%arg0: i32) -> (i32, i32) {
    %c0_i32 = arith.constant 0 : i32
    %c0_i32_0 = arith.constant 0 : i32
    %c0_i32_1 = arith.constant 0 : i32
    return %c0_i32, %c0_i32_0 : i32, i32
  }
  func.func @transform_2(%arg0: i32) -> (i32, i32) {
    %c0_i32 = arith.constant 0 : i32
    %c0_i32_0 = arith.constant 0 : i32
    %c0_i32_1 = arith.constant 0 : i32
    return %c0_i32, %c0_i32_0 : i32, i32
  }
  func.func @transform_3(%arg0: i32) -> (i32, i32) {
    %c0_i32 = arith.constant 0 : i32
    %c0_i32_0 = arith.constant 0 : i32
    %c0_i32_1 = arith.constant 0 : i32
    return %c0_i32, %c0_i32_0 : i32, i32
  }
  func.func @transform_4(%arg0: i32) -> (i32, i32) {
    %c0_i32 = arith.constant 0 : i32
    %c0_i32_0 = arith.constant 0 : i32
    %c0_i32_1 = arith.constant 0 : i32
    return %c0_i32, %c0_i32_0 : i32, i32
  }
  func.func @transform_5(%arg0: i32) -> (i32, i32) {
    %c0_i32 = arith.constant 0 : i32
    %c0_i32_0 = arith.constant 0 : i32
    return %arg0, %c0_i32 : i32, i32
  }
}

</mosaic_0001>

<bundles_post_ra>
// kernel: tpu_custom_call.1
= control target key start
LH: loop header
LB: loop body
LE: loop exit
PB: predicated region body
PF: predicated region fallthrough
CT: control target
= control target key end

     0   :  { %10 = vsyncpa [#allocation3], 0  ;;  %s569_s0 = inlined_call_operand.hbm [shape: f32[2,16], index: 0, kind: input, shape index: {}]   ;;  %s570_s1 = inlined_call_operand.hbm [shape: f32[16,128], index: 1, kind: input, shape index: {}]   ;;  %s571_s2 = inlined_call_operand.vmem [shape: f32[1,128], index: 2, kind: input, shape index: {}]   ;;  %s572_s3 = inlined_call_operand.hbm [shape: f32[128,128], index: 3, kind: input, shape index: {}]   ;;  %s573_s4 = inlined_call_operand.vmem [shape: f32[1,128], index: 4, kind: input, shape index: {}]   ;;  %s574_s5 = inlined_call_operand.hbm [shape: f32[2,60], index: 5, kind: output, shape index: {}]  }
   0x1   :  { %11 = vsyncpa [#allocation6], 0 }
   0x2   :  { %12 = vsyncpa [#allocation4], 0 }
   0x3   :  { %17 = vsyncadd [#allocation3], 96  ;;  %s462_s18 = smov [#allocation5]   ;;  %s368_s22 = scalar_lea.hbm %s570_s1, 256 }
   0x4   :  { %s30_s19 = sshll.u32 %s462_s18, 4  ;;  %p369_p0 = scmp.ne.s32.totalorder %s570_s1, %s368_s22  ;;  %s31_s19 = int_to_ptr.vmem [resolvable:$true] %s30_s19 }
   0x5   :  { %p372_p1 = scmp.lt.u32.totalorder %s368_s22, %s570_s1 }
   0x7   :  { %p374_p2 = pnand %p372_p1, %p369_p0 }
   0x9   :  { %377 = shalt.err (!%p374_p2)
}
   0xa   :  { %s378_s27 = scalar_lea.vmem %s31_s19, 256  ;;  %p383_p4 = scmp.lt.s32.totalorder %s31_s19, %s31_s19 }
   0xb   :  { %p379_p3 = scmp.ne.s32.totalorder %s31_s19, %s378_s27  ;;  %p384_p5 = scmp.lt.s32.totalorder %s378_s27, %s378_s27 }
   0xd   :  { %p385_p6 = por %p384_p5, %p383_p4 }
   0xf   :  { %p386_p7 = pnand %p385_p6, %p379_p3 }
  0x11   :  { %389 = shalt.err (!%p386_p7)
}
  0x12   :  { %s463_s28 = smov 128   ;;  %s464_s29 = smov 8  }
  0x13   :  { %36 = dma.hbm_to_vmem [thread:$0]  %s570_s1, 256, %s31_s19, [#allocation6], %s463_s28, %s463_s28, %s464_s29  }
  0x14   :  { %s465_s7 = smov [#allocation2]   ;;  %s390_s11 = scalar_lea.hbm %s569_s0, 32 }
  0x15   :  { %s18_s8 = sshll.u32 %s465_s7, 4  ;;  %p391_p8 = scmp.ne.s32.totalorder %s569_s0, %s390_s11  ;;  %s19_s8 = int_to_ptr.vmem [resolvable:$true] %s18_s8 }
  0x16   :  { %p394_p9 = scmp.lt.u32.totalorder %s390_s11, %s569_s0 }
  0x18   :  { %p396_p10 = pnand %p394_p9, %p391_p8 }
  0x1a   :  { %399 = shalt.err (!%p396_p10)
}
  0x1b   :  { %s400_s16 = scalar_lea.vmem %s19_s8, 32  ;;  %s404_s1 = scalar_lea.vmem %s19_s8, 128 }
  0x1c   :  { %p401_p11 = scmp.ne.s32.totalorder %s19_s8, %s400_s16  ;;  %p405_p12 = scmp.lt.s32.totalorder %s19_s8, %s19_s8 }
  0x1d   :  { %p406_p13 = scmp.lt.s32.totalorder %s404_s1, %s400_s16 }
  0x1f   :  { %p407_p0 = por %p406_p13, %p405_p12 }
  0x21   :  { %p408_p1 = pnand %p407_p0, %p401_p11 }
  0x23   :  { %411 = shalt.err (!%p408_p1)
}
  0x24   :  { %s466_s17 = smov 32   ;;  %s467_s18 = smov 2  }
  0x25   :  { %24 = dma.hbm_to_vmem [thread:$0]  %s569_s0, 32, %s19_s8, [#allocation3], %s466_s17, %s466_s17, %s467_s18  }
  0x26   :  { %s468_s21 = smov [#allocation7]   ;;  %s412_s25 = scalar_lea.hbm %s572_s3, 2048 }
  0x27   :  { %s44_s22 = sshll.u32 %s468_s21, 4  ;;  %p413_p2 = scmp.ne.s32.totalorder %s572_s3, %s412_s25  ;;  %s45_s22 = int_to_ptr.vmem [resolvable:$true] %s44_s22 }
  0x28   :  { %p416_p3 = scmp.lt.u32.totalorder %s412_s25, %s572_s3 }
  0x2a   :  { %p418_p4 = pnand %p416_p3, %p413_p2 }
  0x2c   :  { %421 = shalt.err (!%p418_p4)
}
  0x2d   :  { %s422_s7 = scalar_lea.vmem %s45_s22, 2048  ;;  %p427_p6 = scmp.lt.s32.totalorder %s45_s22, %s45_s22 }
  0x2e   :  { %p423_p5 = scmp.ne.s32.totalorder %s45_s22, %s422_s7  ;;  %p428_p7 = scmp.lt.s32.totalorder %s422_s7, %s422_s7 }
  0x30   :  { %p429_p8 = por %p428_p7, %p427_p6 }
  0x32   :  { %p430_p9 = pnand %p429_p8, %p423_p5 }
  0x34   :  { %433 = shalt.err (!%p430_p9)
}
  0x35   :  { %50 = dma.hbm_to_vmem [thread:$0]  %s572_s3, 2048, %s45_s22, [#allocation6], %s463_s28, %s463_s28, %s464_s29  }
  0x36   :  { %456 = dma.done.wait [#allocation3], 128  }
  0x37   :  { %457 = vsyncadd [#allocation3], 4294967168 }
  0x38   :  { %458 = dma.done.wait [#allocation6], 2304  }
  0x39   :  { %459 = vsyncadd [#allocation6], 4294964992  ;;  %v469_v0 = vmov 0.0|0.0   ;;  %vm470_vm0 = vmmov 0   ;;  %v471_v1 = vmov 0.0   ;;  %v63_v2 = vld [vmem:[#allocation5] sm:$0xff] }
  0x3a   :  { %330 = vmatprep.subr.bf16.mxu0 %v469_v0  ;;  %292 = vmatprep.mubr.msk.f32.mxu0 %vm470_vm0, %v471_v1  ;;  %v64_v3 = vld [vmem:[#allocation5 + $0x8] sm:$0xff]  ;;  %v149_v5 = vld [vmem:[#allocation7] sm:$0xff]  ;;  %v150_v6 = vld [vmem:[#allocation7 + $0x8] sm:$0xff]  ;;  %vm72_vm1 = vcmask 130048   ;;  %vm245_vm4 = vcmask 490496  }
  0x3b   :  { %333 = vmatprep.subr.bf16.mxu1 %v469_v0  ;;  %327 = vmatprep.mubr.msk.f32.mxu1 %vm470_vm0, %v471_v1  ;;  %v331_v4 = vpack.c.bf16 %v64_v3, %v63_v2  ;;  %v151_v7 = vld [vmem:[#allocation7 + $0x10] sm:$0xff]  ;;  %v334_v8 = vpack.c.bf16 %v150_v6, %v149_v5  ;;  %v152_v9 = vld [vmem:[#allocation7 + $0x18] sm:$0xff]  ;;  %v62_v10 = vld [vmem:[#allocation2] sm:$0xff] }
  0x3c   :  { %v337_v11 = vpack.c.bf16 %v152_v9, %v151_v7  ;;  %v153_v12 = vld [vmem:[#allocation7 + $0x20] sm:$0xff]  ;;  %v154_v13 = vld [vmem:[#allocation7 + $0x28] sm:$0xff]  ;;  %v155_v15 = vld [vmem:[#allocation7 + $0x30] sm:$0xff] }
  0x3d   :  { %332 = vmatpush3.bf16.msra.mxu0 %v331_v4  ;;  %335 = vmatpush3.bf16.msra.mxu1 %v334_v8  ;;  %v340_v14 = vpack.c.bf16 %v154_v13, %v153_v12  ;;  %v156_v16 = vld [vmem:[#allocation7 + $0x38] sm:$0xff]  ;;  %v157_v18 = vld [vmem:[#allocation7 + $0x40] sm:$0xff]  ;;  %v158_v19 = vld [vmem:[#allocation7 + $0x48] sm:$0xff] }
  0x3e   :  { %336 = vmatprep.subr.bf16.mxu1 %v469_v0  ;;  %v343_v17 = vpack.c.bf16 %v156_v16, %v155_v15  ;;  %v346_v20 = vpack.c.bf16 %v158_v19, %v157_v18  ;;  %v159_v21 = vld [vmem:[#allocation7 + $0x50] sm:$0xff]  ;;  %v160_v22 = vld [vmem:[#allocation7 + $0x58] sm:$0xff]  ;;  %v161_v24 = vld [vmem:[#allocation7 + $0x60] sm:$0xff] }
  0x3f   :  { %v349_v23 = vpack.c.bf16 %v160_v22, %v159_v21  ;;  %v162_v25 = vld [vmem:[#allocation7 + $0x68] sm:$0xff]  ;;  %v163_v27 = vld [vmem:[#allocation7 + $0x70] sm:$0xff]  ;;  %v164_v28 = vld [vmem:[#allocation7 + $0x78] sm:$0xff] }
  0x40   :  { %293 = vmatmul.mubr.msk.f32.vlgmr.msra.gmra.mrb[0].mxu0 %vm72_vm1, %v62_v10  ;;  %v352_v26 = vpack.c.bf16 %v162_v25, %v161_v24  ;;  %v355_v29 = vpack.c.bf16 %v164_v28, %v163_v27  ;;  %v265_v30 = vld [vmem:[%s571_s2] ss:$0 sm:$0xff] }
  0x41   :  { %338 = vmatpush3.bf16.msra.mxu1 %v337_v11  ;;  %v267_v36 = vld [vmem:[%s573_s4] ss:$0 sm:$0xff] }
  0x42   :  { %339 = vmatprep.subr.bf16.mxu1 %v469_v0 }
  0x45   :  { %341 = vmatpush3.bf16.msra.mxu1 %v340_v14 }
  0x46   :  { %342 = vmatprep.subr.bf16.mxu1 %v469_v0 }
  0x49   :  { %344 = vmatpush3.bf16.msra.mxu1 %v343_v17 }
  0x4a   :  { %345 = vmatprep.subr.bf16.mxu1 %v469_v0 }
  0x4d   :  { %347 = vmatpush3.bf16.msra.mxu1 %v346_v20 }
  0x4e   :  { %348 = vmatprep.subr.bf16.mxu1 %v469_v0 }
  0x51   :  { %350 = vmatpush3.bf16.msra.mxu1 %v349_v23 }
  0x52   :  { %351 = vmatprep.subr.bf16.mxu1 %v469_v0 }
  0x55   :  { %353 = vmatpush3.bf16.msra.mxu1 %v352_v26 }
  0x56   :  { %354 = vmatprep.subr.bf16.mxu1 %v469_v0 }
  0x59   :  { %356 = vmatpush3.bf16.msra.mxu1 %v355_v29 }
 0x113   :  { %v142_v31 = vpop.f32.mrb[0].mxu0 }
 0x114   :  { %v143_v32 = vadd.f32 %v265_v30, %v142_v31  ;;  %v294_v33 = vpop.f32.mrb[1].mxu0 }
 0x116   :  { %v147_v34 = vmul.f32 0.01, %v143_v32  ;;  %vm146_vm2 = vcmp.gt.f32.partialorder %v143_v32, 0.0 }
 0x118   :  { %v148_v35 = vsel %vm146_vm2, %v143_v32, %v147_v34 }
 0x119   :  { %328 = vmatmul.mubr.f32.vlgmr.msra.gmra.mrb[0].mxu1 %v148_v35 }
 0x1ec   :  { %v238_v37 = vpop.f32.mrb[0].mxu1 }
 0x1ed   :  { %v239_v38 = vadd.f32 %v267_v36, %v238_v37  ;;  %v329_v39 = vpop.f32.mrb[1].mxu1 }
 0x1ef   :  { %vm242_vm3 = vcmp.gt.f32.partialorder %v239_v38, 0.0  ;;  %v243_v40 = vmul.f32 0.01, %v239_v38 }
 0x1f1   :  { %v244_v41 = vsel %vm242_vm3, %v239_v38, %v243_v40 }
 0x1f2   :  { %246 = vst.msk [vmem:[#allocation8] sm:$0xff] %vm245_vm4, %v244_v41 }
 0x1f3   :  { %251 = vsyncadd [#allocation4], 96  ;;  %s472_s2 = smov [#allocation8]  }
 0x1f4   :  { %s252_s10 = sshll.u32 %s472_s2, 4  ;;  %s253_s10 = int_to_ptr.vmem [resolvable:$true] %s252_s10 }
 0x1f5   :  { %s434_s11 = scalar_lea.vmem %s253_s10, 32  ;;  %s438_s12 = scalar_lea.vmem %s253_s10, 128 }
 0x1f6   :  { %p435_p10 = scmp.ne.s32.totalorder %s253_s10, %s434_s11  ;;  %p439_p11 = scmp.lt.s32.totalorder %s253_s10, %s253_s10 }
 0x1f7   :  { %p440_p12 = scmp.lt.s32.totalorder %s438_s12, %s434_s11 }
 0x1f9   :  { %p441_p13 = por %p440_p12, %p439_p11 }
 0x1fb   :  { %p442_p0 = pnand %p441_p13, %p435_p10 }
 0x1fd   :  { %445 = shalt.err (!%p442_p0)
}
 0x1fe   :  { %s446_s14 = scalar_lea.hbm %s574_s5, 32 }
 0x1ff   :  { %p447_p1 = scmp.ne.s32.totalorder %s574_s5, %s446_s14  ;;  %p450_p2 = scmp.lt.u32.totalorder %s446_s14, %s574_s5 }
 0x201   :  { %p452_p3 = pnand %p450_p2, %p447_p1 }
 0x203   :  { %455 = shalt.err (!%p452_p3)
}
 0x204   :  { %258 = dma.vmem_to_hbm [thread:$0]  %s253_s10, 32, %s574_s5, [#allocation4], %s466_s17, %s466_s17, %s467_s18  }
 0x205   :  { %460 = dma.done.wait [#allocation4], 128  }
 0x206   :  { %461 = vsyncadd [#allocation4], 4294967168 }
 0x207   :  { %262 = vsyncpa [#allocation3], 1 }
 0x208   :  { %263 = vsyncpa [#allocation6], 1 }
 0x209   :  { %264 = vsyncpa [#allocation4], 1 }

</bundles_post_ra>
